<compile_context>
chip_gen: v5e
topology: v5e:2x2
jax: 0.10.0
libtpu: 0.0.40
codegen_flags: <defaults>
</compile_context>

<pallas_src>
import jax
import jax.numpy as jnp
from jax.experimental import pallas as pl
from jax.experimental.pallas import tpu as pltpu


def _uncertainty_weighting_kernel(packed_ref, out_ref):
    # packed_ref: (2, P) f32 in VMEM — row 0 = log_vars, row 1 = losses.
    # Sublane slices go through the otherwise-idle XLU; cheaper than a 2nd DMA.
    packed = packed_ref[...]
    lv = packed[0:1, :]                          # (1, P)
    ls = packed[1:2, :]                          # (1, P)
    precision = jnp.exp(-lv)                     # single EUP push
    # Scalar result straight to SMEM (off the vector-store path).
    out_ref[0, 0] = jnp.sum(precision * ls + lv)


def _forward_pallas(lv_sel, ls_sel):
    """lv_sel, ls_sel: (P,) f32 of the *present* tasks. Returns scalar f32."""
    p = lv_sel.shape[0]
    packed = jnp.stack([lv_sel, ls_sel])         # (2, P) f32 — one input DMA
    out = pl.pallas_call(
        _uncertainty_weighting_kernel,
        out_shape=jax.ShapeDtypeStruct((1, 1), jnp.float32),
        in_specs=[pl.BlockSpec(memory_space=pltpu.VMEM)],
        out_specs=pl.BlockSpec(memory_space=pltpu.SMEM),
        cost_estimate=pl.CostEstimate(
            flops=3 * p, transcendentals=p, bytes_accessed=8 * p + 4),
    )(packed)
    return out.reshape(())


@jax.custom_vjp
def _weighted_loss_sum(lv_sel, ls_sel):
    return _forward_pallas(lv_sel, ls_sel)


def _weighted_loss_sum_fwd(lv_sel, ls_sel):
    return _forward_pallas(lv_sel, ls_sel), (lv_sel, ls_sel)


def _weighted_loss_sum_bwd(res, g):
    lv_sel, ls_sel = res
    precision = jnp.exp(-lv_sel)
    d_lv = g * (1.0 - precision * ls_sel)
    d_ls = g * precision
    return d_lv, d_ls


_weighted_loss_sum.defvjp(_weighted_loss_sum_fwd, _weighted_loss_sum_bwd)


def uncertainty_weighting(log_vars, losses_list):
    """Pallas equivalent of UncertaintyWeighting.forward.

    log_vars:    (num_tasks,) f32 parameter
    losses_list: python list of scalar jax arrays or None (length num_tasks)
    returns:     scalar f32 total loss (differentiable w.r.t. log_vars & losses)
    """
    num_tasks = log_vars.shape[0]
    assert len(losses_list) == num_tasks

    lv = jnp.asarray(log_vars, dtype=jnp.float32)

    # Resolve Optional[Tensor] statically (same as the PyTorch python loop).
    present = tuple(i for i, l in enumerate(losses_list) if l is not None)
    if not present:
        return jnp.zeros((), dtype=jnp.float32)

    # Single fused gather + single stack (no per-task slice/stack chains).
    lv_sel = jnp.take(lv, jnp.asarray(present, dtype=jnp.int32))
    ls_sel = jnp.stack(
        [jnp.asarray(losses_list[i], dtype=jnp.float32).reshape(()) for i in present]
    )
    return _weighted_loss_sum(lv_sel, ls_sel)


if __name__ == "__main__":
    num_tasks = 3
    key = jax.random.PRNGKey(0)
    k1, k2 = jax.random.split(key)

    # nn.Parameter(torch.zeros(num_tasks)) perturbed deterministically so that
    # exp(-log_var) is non-trivial.
    log_vars = 0.1 * jax.random.normal(k1, (num_tasks,), dtype=jnp.float32)

    # Example per-task scalar losses; task 1 is None (skipped), like Optional input.
    raw_losses = jax.random.uniform(k2, (num_tasks,), dtype=jnp.float32) * 2.0
    losses_list = [raw_losses[0], None, raw_losses[2]]

    # Forward under jit so the host-side packing fuses with surrounding ops.
    fwd = jax.jit(uncertainty_weighting)
    total = jax.block_until_ready(fwd(log_vars, losses_list))

    # Pure-JAX reference check (mirrors the PyTorch forward loop).
    ref = jnp.float32(0.0)
    for i, l in enumerate(losses_list):
        if l is not None:
            ref = ref + jnp.exp(-log_vars[i]) * l + log_vars[i]
    assert jnp.allclose(total, ref, atol=1e-6), (total, ref)

    # Gradient path (custom_vjp): d/d_log_var_i = 1 - exp(-lv_i) * loss_i for
    # present tasks, 0 for skipped tasks.
    grad_fn = jax.jit(jax.grad(lambda lv: uncertainty_weighting(lv, losses_list)))
    g = jax.block_until_ready(grad_fn(log_vars))
    g_ref = jnp.zeros_like(log_vars)
    for i, l in enumerate(losses_list):
        if l is not None:
            g_ref = g_ref.at[i].set(1.0 - jnp.exp(-log_vars[i]) * l)
    assert jnp.allclose(g, g_ref, atol=1e-6), (g, g_ref)

    # All-None edge case (PyTorch returns 0.0).
    zero_total = jax.block_until_ready(
        uncertainty_weighting(log_vars, [None] * num_tasks))
    assert jnp.allclose(zero_total, 0.0), zero_total

    print("KERNEL_OK")
</pallas_src>

<mosaic_0001>
module attributes {stable_mosaic.version = 11 : i64} {
  func.func @_uncertainty_weighting_kernel(%arg0: memref<2x2xf32, #tpu.memory_space<vmem>>, %arg1: memref<1x1xf32, #tpu.memory_space<smem>>) attributes {dimension_semantics = [], scalar_prefetch = 0 : i64, scratch_operands = 0 : i64, tpu.core_type = #tpu.core_type<tc>} {
    %c0 = arith.constant 0 : index
    %c0_0 = arith.constant 0 : index
    %0 = vector.load %arg0[%c0, %c0_0] : memref<2x2xf32, #tpu.memory_space<vmem>>, vector<2x2xf32>
    %1 = vector.extract_strided_slice %0 {offsets = [0, 0], sizes = [1, 2], strides = [1, 1]} : vector<2x2xf32> to vector<1x2xf32>
    %2 = vector.extract_strided_slice %0 {offsets = [1, 0], sizes = [1, 2], strides = [1, 1]} : vector<2x2xf32> to vector<1x2xf32>
    %cst = arith.constant 0.000000e+00 : f32
    %3 = vector.broadcast %cst : f32 to vector<1x2xf32>
    %4 = arith.subf %3, %1 : vector<1x2xf32>
    %5 = math.exp %4 : vector<1x2xf32>
    %6 = arith.mulf %5, %2 : vector<1x2xf32>
    %7 = arith.addf %6, %1 : vector<1x2xf32>
    %8 = vector.shape_cast %7 : vector<1x2xf32> to vector<1x1x2xf32>
    %cst_1 = arith.constant dense<0.000000e+00> : vector<1xf32>
    %9 = vector.multi_reduction <add>, %8, %cst_1 [1, 2] : vector<1x1x2xf32> to vector<1xf32>
    %10 = vector.shape_cast %9 : vector<1xf32> to vector<1x1x1xf32>
    %11 = vector.extract %10[0, 0, 0] : f32 from vector<1x1x1xf32>
    %c0_2 = arith.constant 0 : index
    %c0_3 = arith.constant 0 : index
    %12 = memref.load %arg1[%c0_2, %c0_3] : memref<1x1xf32, #tpu.memory_space<smem>>
    memref.store %11, %arg1[%c0_2, %c0_3] : memref<1x1xf32, #tpu.memory_space<smem>>
    return
  }
}

</mosaic_0001>

<bundles_post_ra>
// kernel: uncertainty_weighting.1
= control target key start
LH: loop header
LB: loop body
LE: loop exit
PB: predicated region body
PF: predicated region fallthrough
CT: control target
= control target key end

     0   :  { %s82_s0 = inlined_call_operand.vmem [shape: f32[2,2], index: 0, kind: input, shape index: {}]   ;;  %s83_s1 = inlined_call_operand.hbm [shape: f32[1,1], index: 1, kind: output, shape index: {}]  }
   0x1   :  { %v9_v0 = vld [vmem:[%s82_s0] sm:$0x3] }
   0x2   :  { %6 = vsyncpa [#allocation3], 0  ;;  %v10_v1 = vsub.f32 0.0, %v9_v0  ;;  %v14_v3 = vrot.slane %v9_v0, 1  ;;  %vm18_vm0 = vcmask 8192   ;;  %s36_s9 = sshll.u32 %s83_s1, 4  ;;  %s37_s9 = int_to_ptr.hbm [resolvable:$true] %s36_s9 }
   0x3   :  { %s65_s11 = smov [#allocation2]  }
   0x4   :  { %v11_v2 = vmul.f32 1.442695, %v10_v1 }
   0x6   :  { %49 = vpow2.f32 %v11_v2 }
   0xc   :  { %v50_v4 = vpop.eup %49 }
   0xd   :  { %v16_v5 = vmul.f32 %v50_v4, %v14_v3 }
   0xf   :  { %v17_v6 = vadd.f32 %v16_v5, %v9_v0 }
  0x11   :  { %v19_v7 = vsel %vm18_vm0, %v17_v6, 0.0 }
  0x12   :  { %20 = vadd.xlane.f32.xlu0 %v19_v7 }
  0x85   :  { %v21_v8 = vpop.xlane.xlu0 %20 }
  0x86   :  { %v22_v9 = vrot.slane %v21_v8, 4 }
  0x88   :  { %v23_v10 = vadd.f32 %v22_v9, %v21_v8 }
  0x8a   :  { %v24_v11 = vrot.slane %v23_v10, 2 }
  0x8c   :  { %v25_v12 = vadd.f32 %v24_v11, %v23_v10 }
  0x8e   :  { %v26_v13 = vrot.slane %v25_v12, 1 }
  0x90   :  { %v27_v14 = vadd.f32 %v26_v13, %v25_v12 }
  0x92   :  { %46 = vpush %v27_v14 }
  0xc3   :  { %s47_s10 = spop %46 }
  0xc4   :  { %30 = sst [smem:[#allocation2]] %s47_s10 }
  0xc5   :  { %39 = dma.smem_to_hbm %s65_s11, 16, %s37_s9, [#allocation3]  }
  0xc6   :  { %63 = dma.done.wait [#allocation3], 16  }
  0xc7   :  { %64 = vsyncadd [#allocation3], 4294967280 }
  0xc8   :  { %44 = sfence }
  0xc9   :  { %45 = vsyncpa [#allocation3], 1 }

</bundles_post_ra>
